<compile_context>
chip_gen: v7x
topology: tpu7x:2x2x1
jax: 0.10.0
libtpu: 0.0.40
codegen_flags: <defaults>
</compile_context>

<pallas_src>
import functools

import jax
import jax.numpy as jnp
from jax.experimental import pallas as pl
from jax.experimental.pallas import tpu as pltpu

LANES = 128
SUBLANES = 8
MAX_TILE_ROWS = 2048                 # rows of 128 lanes per grid step (sweep 2048-4096 on v7x)
VMEM_LIMIT_BYTES = 32 * 1024 * 1024  # explicit; ample headroom on v5e/v6e/v7x


def _round_up(x, m):
    return -(-x // m) * m


def _loss_f32(mean, var, true):
    """Elementwise heteroscedastic loss, computed in float32."""
    mean = mean.astype(jnp.float32)
    var = jnp.maximum(var.astype(jnp.float32), 1e-6)
    return jnp.exp(-var) * jnp.abs(true.astype(jnp.float32) - mean) + var


def _hete_kernel(mean_ref, var_ref, true_ref, out_ref, *, rows_valid, tile_rows):
    c = pl.program_id(0)   # TensorCore split axis (CORE_PARALLEL when nsplit > 1)
    i = pl.program_id(1)   # reduction step within the split ("arbitrary")

    # Zero the (8, 128) lane-parallel accumulator (the resident output block)
    # at the start of each split's reduction.
    @pl.when(i == 0)
    def _():
        out_ref[...] = jnp.zeros_like(out_ref)

    # Loss math in f32 regardless of the (possibly bf16) input dtype; inputs
    # stream from HBM in their native dtype, so bf16 callers move half the bytes.
    mean = mean_ref[...].astype(jnp.float32)
    var = jnp.maximum(var_ref[...].astype(jnp.float32), 1e-6)
    loss = jnp.exp(-var) * jnp.abs(true_ref[...].astype(jnp.float32) - mean) + var

    # Unclamped logical block id -> rows [row0, row0 + tile_rows) of the kernel
    # input. The clamped-duplicate tail step of an uneven core split is
    # neutralized because row0 uses the *unclamped* index (>= rows_valid), so
    # its masked contribution is exactly zero. Keep this coupling if the split
    # logic ever changes.
    blk = c * pl.num_programs(1) + i
    row0 = blk * tile_rows
    is_full = row0 + tile_rows <= rows_valid

    # Hot path: fully-valid interior blocks skip the mask entirely -- minimal
    # VALU work per element keeps v7x HBM-bound instead of VALU-bound.
    @pl.when(is_full)
    def _():
        out_ref[...] += loss.reshape(tile_rows // SUBLANES, SUBLANES, LANES).sum(axis=0)

    # Tail path: ragged last block and/or clamped duplicate step. Row-level
    # mask only (one iota + one compare) -- no flat-index math, no int32
    # overflow hazard. jnp.where selects, so garbage (even NaN/Inf) in the
    # partial-block padding cannot leak into the sum.
    @pl.when(jnp.logical_not(is_full))
    def _():
        r = jax.lax.broadcasted_iota(jnp.int32, (tile_rows, LANES), 0)
        masked = jnp.where(row0 + r < rows_valid, loss, 0.0)
        out_ref[...] += masked.reshape(tile_rows // SUBLANES, SUBLANES, LANES).sum(axis=0)


def heteroscedastic_loss(y_pred_mean, y_pred_var, y_true, *,
                         max_tile_rows=MAX_TILE_ROWS, num_cores=1):
    """Mean heteroscedastic loss via a single streaming Pallas TPU reduction.

    num_cores: TensorCores to split the row space across. Leave at 1 on
      single-TC chips (v5e/v6e); set to 2 on v7x so each TensorCore streams
      half of the rows (the leading grid axis then uses CORE_PARALLEL).
    """
    assert y_pred_mean.shape == y_pred_var.shape == y_true.shape
    n = y_pred_mean.size
    assert n > 0

    m_flat = jnp.ravel(y_pred_mean)
    v_flat = jnp.ravel(y_pred_var)
    t_flat = jnp.ravel(y_true)

    rows = n // LANES           # full 128-lane rows handled by the kernel
    tail = n - rows * LANES     # <= 127 trailing elements handled in plain JAX
    n_main = rows * LANES

    total = jnp.float32(0.0)

    if rows > 0:
        # No jnp.pad: if n % 128 == 0 this is a pure reshape (no HBM copy); for
        # ragged n only the aligned prefix is passed to the kernel and the tiny
        # tail is summed outside, so no padded copies of the 3 inputs exist.
        def prep(x):
            return (x[:n_main] if tail else x).reshape(rows, LANES)

        m2, v2, t2 = prep(m_flat), prep(v_flat), prep(t_flat)

        # Row alignment: 8 for 4-byte dtypes, 16 for bf16/f16, 32 for 1-byte,
        # so block rows respect sublane packing for every input dtype. The
        # accumulator reshape also needs tile_rows % 8 == 0.
        min_itemsize = min(a.dtype.itemsize for a in (m2, v2, t2))
        row_align = max(SUBLANES, 32 // max(min_itemsize, 1))
        max_tile_rows = _round_up(max(max_tile_rows, row_align), row_align)

        # Big tiles amortize the ~0.35us per-grid-step overhead (matters most
        # at v7x's ~3.2 TB/s). 3 f32 inputs, double buffered, at 2048x128 rows
        # is ~6 MiB of VMEM -- far below the scoped limit on every generation.
        tile_rows = _round_up(rows, row_align) if rows <= max_tile_rows else max_tile_rows
        total_steps = -(-rows // tile_rows)

        nsplit = max(1, min(int(num_cores), total_steps))
        steps_per_split = -(-total_steps // nsplit)
        last_block = total_steps - 1

        def in_map(c, i):
            # Clamp so a possible extra tail step of an uneven core split never
            # DMAs past the last row block; the in-kernel mask (which uses the
            # *unclamped* block id) zeroes its contribution.
            return (jnp.minimum(c * steps_per_split + i, last_block), 0)

        # NOTE: pipeline_mode=pl.Buffered(3) on the input specs is a small
        # optional win on v5e once tiles are large; default double-buffering here.
        in_spec = pl.BlockSpec((tile_rows, LANES), in_map)
        # One (8, 128) lane-dense partial-sum slab per split; it stays resident
        # across the inner ("arbitrary") axis => acts as the accumulator.
        out_spec = pl.BlockSpec((None, SUBLANES, LANES), lambda c, i: (c, 0, 0))

        lead_sem = pltpu.CORE_PARALLEL if nsplit > 1 else pltpu.ARBITRARY

        partials = pl.pallas_call(
            functools.partial(_hete_kernel, rows_valid=rows, tile_rows=tile_rows),
            out_shape=jax.ShapeDtypeStruct((nsplit, SUBLANES, LANES), jnp.float32),
            grid_spec=pltpu.PrefetchScalarGridSpec(
                num_scalar_prefetch=0,
                grid=(nsplit, steps_per_split),
                in_specs=[in_spec, in_spec, in_spec],
                out_specs=out_spec,
            ),
            compiler_params=pltpu.CompilerParams(
                dimension_semantics=(lead_sem, pltpu.ARBITRARY),
                vmem_limit_bytes=VMEM_LIMIT_BYTES,
            ),
        )(m2, v2, t2)

        # Final tiny cross-lane reduction outside the kernel.
        total = total + jnp.sum(partials)

    if tail > 0:
        total = total + jnp.sum(
            _loss_f32(m_flat[n_main:], v_flat[n_main:], t_flat[n_main:]))

    return total / n


def heteroscedastic_loss_ref(y_pred_mean, y_pred_var, y_true):
    return jnp.mean(_loss_f32(y_pred_mean, y_pred_var, y_true))


if __name__ == "__main__":
    key = jax.random.PRNGKey(0)
    k1, k2, k3 = jax.random.split(key, 3)

    def check(shape, dtype=jnp.float32, rtol=1e-5, atol=1e-5):
        a = jax.random.normal(k1, shape, dtype=dtype)
        b = jax.random.normal(k2, shape, dtype=dtype)
        t = jax.random.normal(k3, shape, dtype=dtype)
        out = jax.block_until_ready(heteroscedastic_loss(a, b, t))
        ref = heteroscedastic_loss_ref(a, b, t)
        assert jnp.allclose(out, ref, rtol=rtol, atol=atol), (shape, dtype, out, ref)

    # Primary check: small NCHW shape implied by the PyTorch module.
    check((2, 4, 16, 16))

    # Ragged element count (not a multiple of 128) with multiple row blocks:
    # exercises the masked partial last block, multi-step accumulation and the
    # plain-JAX <=127-element tail.  327600 elems -> 2559 rows + 48-elem tail.
    check((10, 8, 63, 65))

    # Tiny ragged input: 255 elements -> one masked partial (8,128) block plus
    # a 127-element tail.
    check((3, 5, 17))

    # Sub-row input (n < 128): handled entirely by the plain-JAX tail path.
    check((7,))

    # bf16 inputs: streamed in bf16 (half the HBM bytes), loss math in f32.
    check((4, 256), dtype=jnp.bfloat16)

    print("KERNEL_OK")
</pallas_src>

<mosaic_0001>
module attributes {stable_mosaic.version = 11 : i64} {
  func.func @_hete_kernel(%arg0: i32, %arg1: i32, %arg2: memref<16x128xf32, #tpu.memory_space<vmem>>, %arg3: memref<16x128xf32, #tpu.memory_space<vmem>>, %arg4: memref<16x128xf32, #tpu.memory_space<vmem>>, %arg5: memref<1x8x128xf32, #tpu.memory_space<vmem>>) attributes {dimension_semantics = [#tpu.dimension_semantics<arbitrary>, #tpu.dimension_semantics<arbitrary>], iteration_bounds = array<i64: 1, 1>, scalar_prefetch = 0 : i64, scratch_operands = 0 : i64, tpu.core_type = #tpu.core_type<tc>, window_params = [{transform_indices = @transform_0, window_bounds = array<i64: 16, 128>}, {transform_indices = @transform_1, window_bounds = array<i64: 16, 128>}, {transform_indices = @transform_2, window_bounds = array<i64: 16, 128>}, {transform_indices = @transform_3, window_bounds = array<i64: 1, 8, 128>}]} {
    %c0_i32 = arith.constant 0 : i32
    %0 = arith.cmpi eq, %arg1, %c0_i32 : i32
    %1 = arith.extui %0 : i1 to i32
    %c0_i32_0 = arith.constant 0 : i32
    %2 = arith.cmpi ne, %1, %c0_i32_0 : i32
    scf.if %2 {
      %cst_11 = arith.constant 0.000000e+00 : f32
      %25 = vector.broadcast %cst_11 : f32 to vector<8x128xf32>
      %c0_12 = arith.constant 0 : index
      %c0_13 = arith.constant 0 : index
      %c0_14 = arith.constant 0 : index
      %26 = vector.load %arg5[%c0_12, %c0_13, %c0_14] : memref<1x8x128xf32, #tpu.memory_space<vmem>>, vector<1x8x128xf32>
      %27 = vector.shape_cast %26 : vector<1x8x128xf32> to vector<8x128xf32>
      %28 = vector.shape_cast %25 : vector<8x128xf32> to vector<1x8x128xf32>
      tpu.vector_store %arg5[%c0_12, %c0_13, %c0_14], %28 {strides = array<i32>} : memref<1x8x128xf32, #tpu.memory_space<vmem>>, vector<1x8x128xf32>,
    } else {
    }
    %c0 = arith.constant 0 : index
    %c0_1 = arith.constant 0 : index
    %3 = vector.load %arg2[%c0, %c0_1] : memref<16x128xf32, #tpu.memory_space<vmem>>, vector<16x128xf32>
    %c0_2 = arith.constant 0 : index
    %c0_3 = arith.constant 0 : index
    %4 = vector.load %arg3[%c0_2, %c0_3] : memref<16x128xf32, #tpu.memory_space<vmem>>, vector<16x128xf32>
    %cst = arith.constant 9.99999997E-7 : f32
    %5 = vector.broadcast %cst : f32 to vector<16x128xf32>
    %6 = arith.maximumf %4, %5 : vector<16x128xf32>
    %cst_4 = arith.constant 0.000000e+00 : f32
    %7 = vector.broadcast %cst_4 : f32 to vector<16x128xf32>
    %8 = arith.subf %7, %6 : vector<16x128xf32>
    %9 = math.exp %8 : vector<16x128xf32>
    %c0_5 = arith.constant 0 : index
    %c0_6 = arith.constant 0 : index
    %10 = vector.load %arg4[%c0_5, %c0_6] : memref<16x128xf32, #tpu.memory_space<vmem>>, vector<16x128xf32>
    %11 = arith.subf %10, %3 : vector<16x128xf32>
    %12 = math.absf %11 : vector<16x128xf32>
    %13 = arith.mulf %9, %12 : vector<16x128xf32>
    %14 = arith.addf %13, %6 : vector<16x128xf32>
    %c1_i32 = arith.constant 1 : i32
    %15 = arith.muli %arg0, %c1_i32 : i32
    %16 = arith.addi %15, %arg1 : i32
    %c16_i32 = arith.constant 16 : i32
    %17 = arith.muli %16, %c16_i32 : i32
    %c16_i32_7 = arith.constant 16 : i32
    %18 = arith.addi %17, %c16_i32_7 : i32
    %c16_i32_8 = arith.constant 16 : i32
    %19 = arith.cmpi sle, %18, %c16_i32_8 : i32
    %20 = arith.extui %19 : i1 to i32
    %c0_i32_9 = arith.constant 0 : i32
    %21 = arith.cmpi ne, %20, %c0_i32_9 : i32
    scf.if %21 {
      %c0_11 = arith.constant 0 : index
      %c0_12 = arith.constant 0 : index
      %c0_13 = arith.constant 0 : index
      %25 = vector.load %arg5[%c0_11, %c0_12, %c0_13] : memref<1x8x128xf32, #tpu.memory_space<vmem>>, vector<1x8x128xf32>
      %26 = vector.shape_cast %25 : vector<1x8x128xf32> to vector<8x128xf32>
      %27 = vector.shape_cast %14 : vector<16x128xf32> to vector<2x8x128xf32>
      %cst_14 = arith.constant dense<0.000000e+00> : vector<8x128xf32>
      %28 = vector.multi_reduction <add>, %27, %cst_14 [0] : vector<2x8x128xf32> to vector<8x128xf32>
      %29 = arith.addf %26, %28 : vector<8x128xf32>
      %c0_15 = arith.constant 0 : index
      %c0_16 = arith.constant 0 : index
      %c0_17 = arith.constant 0 : index
      %30 = vector.load %arg5[%c0_15, %c0_16, %c0_17] : memref<1x8x128xf32, #tpu.memory_space<vmem>>, vector<1x8x128xf32>
      %31 = vector.shape_cast %30 : vector<1x8x128xf32> to vector<8x128xf32>
      %32 = vector.shape_cast %29 : vector<8x128xf32> to vector<1x8x128xf32>
      tpu.vector_store %arg5[%c0_15, %c0_16, %c0_17], %32 {strides = array<i32>} : memref<1x8x128xf32, #tpu.memory_space<vmem>>, vector<1x8x128xf32>,
    } else {
    }
    %true = arith.constant true
    %22 = arith.xori %19, %true : i1
    %23 = arith.extui %22 : i1 to i32
    %c0_i32_10 = arith.constant 0 : i32
    %24 = arith.cmpi ne, %23, %c0_i32_10 : i32
    scf.if %24 {
      %25 = tpu.iota {dimensions = array<i32: 0>} : vector<16x128xi32>
      %26 = vector.broadcast %17 : i32 to vector<16x128xi32>
      %27 = arith.addi %26, %25 : vector<16x128xi32>
      %c16_i32_11 = arith.constant 16 : i32
      %28 = vector.broadcast %c16_i32_11 : i32 to vector<16x128xi32>
      %29 = arith.cmpi slt, %27, %28 : vector<16x128xi32>
      %cst_12 = arith.constant 0.000000e+00 : f32
      %30 = vector.broadcast %cst_12 : f32 to vector<16x128xf32>
      %31 = arith.select %29, %14, %30 : vector<16x128xi1>, vector<16x128xf32>
      %c0_13 = arith.constant 0 : index
      %c0_14 = arith.constant 0 : index
      %c0_15 = arith.constant 0 : index
      %32 = vector.load %arg5[%c0_13, %c0_14, %c0_15] : memref<1x8x128xf32, #tpu.memory_space<vmem>>, vector<1x8x128xf32>
      %33 = vector.shape_cast %32 : vector<1x8x128xf32> to vector<8x128xf32>
      %34 = vector.shape_cast %31 : vector<16x128xf32> to vector<2x8x128xf32>
      %cst_16 = arith.constant dense<0.000000e+00> : vector<8x128xf32>
      %35 = vector.multi_reduction <add>, %34, %cst_16 [0] : vector<2x8x128xf32> to vector<8x128xf32>
      %36 = arith.addf %33, %35 : vector<8x128xf32>
      %c0_17 = arith.constant 0 : index
      %c0_18 = arith.constant 0 : index
      %c0_19 = arith.constant 0 : index
      %37 = vector.load %arg5[%c0_17, %c0_18, %c0_19] : memref<1x8x128xf32, #tpu.memory_space<vmem>>, vector<1x8x128xf32>
      %38 = vector.shape_cast %37 : vector<1x8x128xf32> to vector<8x128xf32>
      %39 = vector.shape_cast %36 : vector<8x128xf32> to vector<1x8x128xf32>
      tpu.vector_store %arg5[%c0_17, %c0_18, %c0_19], %39 {strides = array<i32>} : memref<1x8x128xf32, #tpu.memory_space<vmem>>, vector<1x8x128xf32>,
    } else {
    }
    return
  }
  func.func @transform_0(%arg0: i32, %arg1: i32) -> (i32, i32) {
    %c1_i32 = arith.constant 1 : i32
    %0 = arith.muli %arg0, %c1_i32 : i32
    %1 = arith.addi %0, %arg1 : i32
    %c0_i32 = arith.constant 0 : i32
    %2 = arith.minsi %1, %c0_i32 : i32
    %c0_i32_0 = arith.constant 0 : i32
    %c0_i32_1 = arith.constant 0 : i32
    return %2, %c0_i32_0 : i32, i32
  }
  func.func @transform_1(%arg0: i32, %arg1: i32) -> (i32, i32) {
    %c1_i32 = arith.constant 1 : i32
    %0 = arith.muli %arg0, %c1_i32 : i32
    %1 = arith.addi %0, %arg1 : i32
    %c0_i32 = arith.constant 0 : i32
    %2 = arith.minsi %1, %c0_i32 : i32
    %c0_i32_0 = arith.constant 0 : i32
    %c0_i32_1 = arith.constant 0 : i32
    return %2, %c0_i32_0 : i32, i32
  }
  func.func @transform_2(%arg0: i32, %arg1: i32) -> (i32, i32) {
    %c1_i32 = arith.constant 1 : i32
    %0 = arith.muli %arg0, %c1_i32 : i32
    %1 = arith.addi %0, %arg1 : i32
    %c0_i32 = arith.constant 0 : i32
    %2 = arith.minsi %1, %c0_i32 : i32
    %c0_i32_0 = arith.constant 0 : i32
    %c0_i32_1 = arith.constant 0 : i32
    return %2, %c0_i32_0 : i32, i32
  }
  func.func @transform_3(%arg0: i32, %arg1: i32) -> (i32, i32, i32) {
    %c0_i32 = arith.constant 0 : i32
    %c0_i32_0 = arith.constant 0 : i32
    %c0_i32_1 = arith.constant 0 : i32
    return %arg0, %c0_i32, %c0_i32_0 : i32, i32, i32
  }
}

</mosaic_0001>

<bundles_post_ra>
// kernel: tpu_custom_call.1
= control target key start
LH: loop header
LB: loop body
LE: loop exit
PB: predicated region body
PF: predicated region fallthrough
CT: control target
= control target key end

     0   :  { %8 = vsyncpa [#allocation3], 0  ;;  %s359_s0 = inlined_call_operand.hbm [shape: f32[16,128], index: 0, kind: input, shape index: {}]   ;;  %s360_s1 = inlined_call_operand.hbm [shape: f32[16,128], index: 1, kind: input, shape index: {}]   ;;  %s361_s2 = inlined_call_operand.hbm [shape: f32[16,128], index: 2, kind: input, shape index: {}]   ;;  %s362_s3 = inlined_call_operand.hbm [shape: f32[1,8,128], index: 3, kind: output, shape index: {}]  }
   0x1   :  { %9 = vsyncpa [#allocation6], 0 }
   0x2   :  { %10 = vsyncpa [#allocation4], 0  ;;  %s269_s12 = smov [#allocation5]   ;;  %s270_s14 = smov [#allocation2]  }
   0x3   :  { %s40_s13 = sshll.u32 %s269_s12, 4  ;;  %s22_s15 = sshll.u32 %s270_s14, 4  ;;  %s41_s13 = int_to_ptr.vmem [resolvable:$true] %s40_s13  ;;  %s295_s15 = int_to_ptr.vmem [resolvable:$true] %s22_s15 }
   0x4   :  { %s175_s18 = scalar_lea.hbm %s360_s1, 256 }
   0x5   :  { %p176_p0 = scmp.ne.s32.totalorder %s360_s1, %s175_s18  ;;  %p179_p1 = scmp.lt.u32.totalorder %s175_s18, %s360_s1 }
   0x7   :  { %p181_p2 = pnand %p179_p1, %p176_p0 }
   0x9   :  { %184 = shalt.err (!%p181_p2)
}
   0xa   :  { %s185_s23 = scalar_lea.vmem %s41_s13, 256  ;;  %p190_p4 = scmp.lt.s32.totalorder %s41_s13, %s41_s13 }
   0xb   :  { %p186_p3 = scmp.ne.s32.totalorder %s41_s13, %s185_s23  ;;  %p191_p5 = scmp.lt.s32.totalorder %s185_s23, %s185_s23 }
   0xd   :  { %p192_p6 = por %p191_p5, %p190_p4 }
   0xf   :  { %p193_p7 = pnand %p192_p6, %p186_p3 }
  0x11   :  { %196 = shalt.err (!%p193_p7)
}
  0x12   :  { %s271_s24 = smov 128   ;;  %s272_s25 = smov 8  }
  0x13   :  { %46 = dma.hbm_to_vmem [thread:$0]  %s360_s1, 256, %s41_s13, [#allocation6], %s271_s24, %s271_s24, %s272_s25  }
  0x14   :  { %s197_s30 = scalar_lea.hbm %s359_s0, 256 }
  0x15   :  { %p198_p8 = scmp.ne.s32.totalorder %s359_s0, %s197_s30  ;;  %p201_p9 = scmp.lt.u32.totalorder %s197_s30, %s359_s0 }
  0x17   :  { %p203_p10 = pnand %p201_p9, %p198_p8 }
  0x19   :  { %206 = shalt.err (!%p203_p10)
}
  0x1a   :  { %s207_s8 = scalar_lea.vmem %s295_s15, 256  ;;  %p212_p12 = scmp.lt.s32.totalorder %s295_s15, %s295_s15 }
  0x1b   :  { %p208_p11 = scmp.ne.s32.totalorder %s295_s15, %s207_s8  ;;  %p213_p13 = scmp.lt.s32.totalorder %s207_s8, %s207_s8 }
  0x1d   :  { %p214_p0 = por %p213_p13, %p212_p12 }
  0x1f   :  { %p215_p1 = pnand %p214_p0, %p208_p11 }
  0x21   :  { %218 = shalt.err (!%p215_p1)
}
  0x22   :  { %28 = dma.hbm_to_vmem [thread:$0]  %s359_s0, 256, %s295_s15, [#allocation3], %s271_s24, %s271_s24, %s272_s25  }
  0x23   :  { %s273_s10 = smov [#allocation7]   ;;  %s219_s14 = scalar_lea.hbm %s361_s2, 256 }
  0x24   :  { %s58_s11 = sshll.u32 %s273_s10, 4  ;;  %p220_p2 = scmp.ne.s32.totalorder %s361_s2, %s219_s14  ;;  %s59_s11 = int_to_ptr.vmem [resolvable:$true] %s58_s11 }
  0x25   :  { %p223_p3 = scmp.lt.u32.totalorder %s219_s14, %s361_s2 }
  0x27   :  { %p225_p4 = pnand %p223_p3, %p220_p2 }
  0x29   :  { %228 = shalt.err (!%p225_p4)
}
  0x2a   :  { %s229_s20 = scalar_lea.vmem %s59_s11, 256  ;;  %p234_p6 = scmp.lt.s32.totalorder %s59_s11, %s59_s11 }
  0x2b   :  { %p230_p5 = scmp.ne.s32.totalorder %s59_s11, %s229_s20  ;;  %p235_p7 = scmp.lt.s32.totalorder %s229_s20, %s229_s20 }
  0x2d   :  { %p236_p8 = por %p235_p7, %p234_p6 }
  0x2f   :  { %p237_p9 = pnand %p236_p8, %p230_p5 }
  0x31   :  { %240 = shalt.err (!%p237_p9)
}
  0x32   :  { %64 = dma.hbm_to_vmem [thread:$0]  %s361_s2, 256, %s59_s11, [#allocation6], %s271_s24, %s271_s24, %s272_s25  }
  0x33   :  { %263 = dma.done.wait [#allocation3], 256  }
  0x34   :  { %264 = vsyncadd [#allocation3], 4294967040 }
  0x35   :  { %265 = dma.done.wait [#allocation6], 512  }
  0x36   :  { %266 = vsyncadd [#allocation6], 4294966784  ;;  %v93_v0 = vld [vmem:[#allocation5] sm:$0xff]  ;;  %v94_v1 = vld [vmem:[#allocation5 + $0x8] sm:$0xff]  ;;  %s274_s2 = smov [#allocation8]  }
  0x37   :  { %v95_v2 = vmax.f32 %v93_v0, 1e-06  ;;  %v96_v3 = vmax.f32 %v94_v1, 1e-06  ;;  %v91_v8 = vld [vmem:[#allocation2] sm:$0xff]  ;;  %v92_v10 = vld [vmem:[#allocation2 + $0x8] sm:$0xff] }
  0x38   :  { %v103_v9 = vld [vmem:[#allocation7] sm:$0xff]  ;;  %v104_v11 = vld [vmem:[#allocation7 + $0x8] sm:$0xff]  ;;  %s148_s21 = sshll.u32 %s274_s2, 4  ;;  %s149_s21 = int_to_ptr.vmem [resolvable:$true] %s148_s21 }
  0x39   :  { %v97_v4 = vsub.f32 0.0, %v95_v2  ;;  %v98_v5 = vsub.f32 0.0, %v96_v3  ;;  %v105_v12 = vsub.f32 %v103_v9, %v91_v8  ;;  %v106_v13 = vsub.f32 %v104_v11, %v92_v10  ;;  %s241_s22 = scalar_lea.vmem %s149_s21, 128  ;;  %p246_p11 = scmp.lt.s32.totalorder %s149_s21, %s149_s21 }
  0x3a   :  { %p242_p10 = scmp.ne.s32.totalorder %s149_s21, %s241_s22  ;;  %p247_p12 = scmp.lt.s32.totalorder %s241_s22, %s241_s22 }
  0x3b   :  { %v99_v6 = vmul.f32 1.442695, %v97_v4  ;;  %v101_v7 = vmul.f32 1.442695, %v98_v5  ;;  %v107_v14 = vand.u32 2147483647, %v105_v12 }
  0x3c   :  { %v108_v15 = vand.u32 2147483647, %v106_v13  ;;  %p248_p13 = por %p247_p12, %p246_p11 }
  0x3d   :  { %171 = vpow2.f32 %v99_v6 }
  0x3e   :  { %173 = vpow2.f32 %v101_v7  ;;  %p249_p0 = pnand %p248_p13, %p242_p10 }
  0x47   :  { %v172_v16 = vpop.eup %171 }
  0x48   :  { %v174_v17 = vpop.eup %173  ;;  %v109_v18 = vmul.f32 %v172_v16, %v107_v14 }
  0x49   :  { %v110_v19 = vmul.f32 %v174_v17, %v108_v15 }
  0x4a   :  { %v111_v20 = vadd.f32 %v109_v18, %v95_v2 }
  0x4b   :  { %v112_v21 = vadd.f32 %v110_v19, %v96_v3 }
  0x4d   :  { %v121_v22 = vadd.f32 %v112_v21, %v111_v20 }
  0x4f   :  { %123 = vst [vmem:[#allocation8] sm:$0xff] %v121_v22 }
  0x50   :  { %252 = shalt.err (!%p249_p0)
}
  0x51   :  { %s253_s25 = scalar_lea.hbm %s362_s3, 128 }
  0x52   :  { %p254_p1 = scmp.ne.s32.totalorder %s362_s3, %s253_s25  ;;  %p257_p2 = scmp.lt.u32.totalorder %s253_s25, %s362_s3 }
  0x54   :  { %p259_p3 = pnand %p257_p2, %p254_p1 }
  0x56   :  { %262 = shalt.err (!%p259_p3)
}
  0x57   :  { %151 = dma.vmem_to_hbm [thread:$0]  %s149_s21, 128, %s362_s3, [#allocation4]  }
  0x58   :  { %267 = dma.done.wait [#allocation4], 128  }
  0x59   :  { %268 = vsyncadd [#allocation4], 4294967168 }
  0x5a   :  { %155 = vsyncpa [#allocation3], 1 }
  0x5b   :  { %156 = vsyncpa [#allocation6], 1 }
  0x5c   :  { %157 = vsyncpa [#allocation4], 1 }

</bundles_post_ra>
